<compile_context>
chip_gen: v7x
topology: tpu7x:2x2x1
jax: 0.10.0
libtpu: 0.0.40
codegen_flags: <defaults>
</compile_context>

<pallas_src>
import jax
import jax.numpy as jnp
from jax.experimental import pallas as pl
from jax.experimental.pallas import tpu as pltpu

LANE = 128
SUBLANE = 8
CHUNK_ROWS = 1024          # bounds in-tile temporaries to ~0.5 MiB f32
_BYPASS_ELEMS = 32768      # below this, plain XLA beats a one-step pallas_call


def _round_up(x, m):
    return ((x + m - 1) // m) * m


def _device_config():
    """Generation-aware tile size, TC split count and VMEM limit."""
    try:
        kind = jax.devices()[0].device_kind.lower()
    except Exception:  # pragma: no cover - defensive
        kind = ""
    if "v7" in kind:
        # 64 MiB physical VMEM per TC; 24 MiB of double-buffers + small temps.
        return {"max_tile_rows": 8192, "splits": 2, "vmem_limit": 48 << 20}
    if "v6" in kind:
        # 128 MiB physical; raise scoped limit past the 32 MiB default.
        return {"max_tile_rows": 8192, "splits": 1, "vmem_limit": 48 << 20}
    if "v5 lite" in kind or "v5e" in kind or "v5litepod" in kind:
        # 16 MiB default scoped VMEM -> cap tiles at 4096 rows, raise limit.
        return {"max_tile_rows": 4096, "splits": 1, "vmem_limit": 40 << 20}
    # Unknown generation (v4/v5p/...): keep the conservative, proven config.
    return {"max_tile_rows": 2048, "splits": 1, "vmem_limit": None}


def _make_kernel(n_streams, rows, tile_rows, chunk, steps_per_split,
                 may_need_mask):
    """Accumulate sum((pred_s - target)^2) per stream into (8,128) slabs."""
    n_chunks = tile_rows // chunk

    def accumulate(pred_refs, t_ref, o_ref, rem, masked):
        accs = [o_ref[0, s] for s in range(n_streams)]
        if masked:
            # Hoisted once per (masked) tile, reused for every chunk.
            row_iota = jax.lax.broadcasted_iota(jnp.int32, (chunk, LANE), 0)
        for c in range(n_chunks):
            sl = pl.ds(c * chunk, chunk)
            tc = t_ref[sl, :].astype(jnp.float32)   # target read once / chunk
            if masked:
                m = row_iota < (rem - c * chunk)
            for s in range(n_streams):
                d = pred_refs[s][sl, :].astype(jnp.float32) - tc
                if masked:
                    d = jnp.where(m, d, 0.0)        # mask BEFORE squaring
                sq = d * d
                # Fold (chunk, 128) -> (8, 128): leading-axis reduce = pure
                # VPU adds; the cross-lane reduce happens once, outside.
                accs[s] = accs[s] + jnp.sum(
                    sq.reshape(chunk // SUBLANE, SUBLANE, LANE), axis=0)
        for s in range(n_streams):
            o_ref[0, s] = accs[s]

    def kernel(*refs):
        pred_refs = refs[:n_streams]
        t_ref = refs[n_streams]
        o_ref = refs[n_streams + 1]  # block: (1, n_streams, 8, 128)

        @pl.when(pl.program_id(1) == 0)
        def _():
            o_ref[...] = jnp.zeros_like(o_ref)

        if may_need_mask:
            logical = pl.program_id(0) * steps_per_split + pl.program_id(1)
            rem = rows - logical * tile_rows   # rows still to cover

            @pl.when(rem >= tile_rows)        # full tile: unmasked fast path
            def _():
                accumulate(pred_refs, t_ref, o_ref, rem, masked=False)

            @pl.when(rem < tile_rows)         # tail / clamp-duplicated tile
            def _():
                accumulate(pred_refs, t_ref, o_ref, rem, masked=True)
        else:
            accumulate(pred_refs, t_ref, o_ref, None, masked=False)

    return kernel


def _sq_diff_sums(preds, targets, *, max_tile_rows=None, force_splits=None):
    """Returns a (len(preds),) f32 vector of sum((p - target)^2)."""
    n = targets.size
    n_streams = len(preds)

    # Small-input bypass: a one-step pallas_call is pure launch overhead.
    if n < _BYPASS_ELEMS:
        t32 = targets.reshape(-1).astype(jnp.float32)
        return jnp.stack(
            [jnp.sum((p.reshape(-1).astype(jnp.float32) - t32) ** 2)
             for p in preds])

    cfg = _device_config()
    if max_tile_rows is None:
        max_tile_rows = cfg["max_tile_rows"]
    assert max_tile_rows % SUBLANE == 0
    splits_cap = force_splits if force_splits is not None else cfg["splits"]

    padded = _round_up(n, LANE)

    def to_slab(x):
        x = x.reshape(-1)                      # free (contiguous, row-major)
        if padded != n:
            # Both preds and target are padded identically with zeros, so the
            # pad contributes exactly (0-0)^2 = 0.  See TODO(synk) above.
            x = jnp.pad(x, (0, padded - n))
        return x.reshape(-1, LANE)             # lane-dense 2-D view

    slabs = [to_slab(p) for p in preds] + [to_slab(targets)]
    rows = padded // LANE

    tile_rows = min(max_tile_rows, _round_up(rows, SUBLANE))
    chunk = min(CHUNK_ROWS, tile_rows)
    if tile_rows % chunk:
        chunk = tile_rows                      # single-block odd sizes

    num_blocks = (rows + tile_rows - 1) // tile_rows
    num_splits = splits_cap if num_blocks >= 2 else 1   # 2-TC split (v7x only)
    steps_per_split = (num_blocks + num_splits - 1) // num_splits
    need_clamp = num_splits * steps_per_split != num_blocks
    may_need_mask = num_splits * steps_per_split * tile_rows != rows
    last_block = num_blocks - 1

    if need_clamp:
        # Duplicate the last block for the overhanging grid step; its
        # contribution is zeroed by the in-kernel row mask (rem <= 0).
        def in_map(c, i):
            return (jnp.minimum(c * steps_per_split + i, last_block), 0)
    else:
        def in_map(c, i):
            return (c * steps_per_split + i, 0)

    kernel = _make_kernel(n_streams, rows, tile_rows, chunk, steps_per_split,
                          may_need_mask)

    cparams = {"dimension_semantics": ("parallel", "arbitrary")}
    if cfg["vmem_limit"] is not None:
        cparams["vmem_limit_bytes"] = cfg["vmem_limit"]

    partials = pl.pallas_call(
        kernel,
        out_shape=jax.ShapeDtypeStruct(
            (num_splits, n_streams, SUBLANE, LANE), jnp.float32),
        grid_spec=pltpu.PrefetchScalarGridSpec(
            num_scalar_prefetch=0,
            grid=(num_splits, steps_per_split),
            in_specs=[pl.BlockSpec((tile_rows, LANE), in_map)
                      for _ in range(n_streams + 1)],
            out_specs=pl.BlockSpec(
                (1, n_streams, SUBLANE, LANE), lambda c, i: (c, 0, 0, 0)),
        ),
        compiler_params=pltpu.CompilerParams(**cparams),
    )(*slabs)

    # Tiny final cross-lane reduce (splits x streams x 8 x 128) in plain XLA.
    # Note: per-lane f32 running sums are fine at NeRF scales; >~1e8 elements
    # per lane bucket would need a hierarchical sum for full precision.
    return jnp.sum(partials, axis=(0, 2, 3))


def mse_loss(inputs, targets):
    """Mirrors the PyTorch MSELoss module's forward."""
    preds = [inputs["coarse"]["rgb"]]
    if "fine" in inputs:
        preds.append(inputs["fine"]["rgb"])
    sums = _sq_diff_sums(tuple(preds), targets)
    n = targets.size  # all streams share targets' shape -> same denominator
    return jnp.sum(sums) / jnp.float32(n)


if __name__ == "__main__":
    key = jax.random.PRNGKey(0)
    k1, k2, k3 = jax.random.split(key, 3)

    loss_fn = jax.jit(mse_loss)

    # 1) Streaming Pallas path, lane-aligned element count (2*8192*3 = 49152).
    shape = (2, 8192, 3)
    coarse = jax.random.uniform(k1, shape, dtype=jnp.float32)
    fine = jax.random.uniform(k2, shape, dtype=jnp.float32)
    tgt = jax.random.uniform(k3, shape, dtype=jnp.float32)
    inputs = {"coarse": {"rgb": coarse}, "fine": {"rgb": fine}}
    loss = jax.block_until_ready(loss_fn(inputs, tgt))
    ref = jnp.mean((coarse - tgt) ** 2) + jnp.mean((fine - tgt) ** 2)
    assert jnp.allclose(loss, ref, rtol=1e-5, atol=1e-6), (loss, ref)

    # 2) Ragged element count (2*8193*3 = 49158) -> padded + masked tail tile.
    kr1, kr2, kr3 = jax.random.split(jax.random.PRNGKey(1), 3)
    shape_r = (2, 8193, 3)
    coarse_r = jax.random.uniform(kr1, shape_r, dtype=jnp.float32)
    fine_r = jax.random.uniform(kr2, shape_r, dtype=jnp.float32)
    tgt_r = jax.random.uniform(kr3, shape_r, dtype=jnp.float32)
    loss_r = jax.block_until_ready(
        loss_fn({"coarse": {"rgb": coarse_r}, "fine": {"rgb": fine_r}}, tgt_r))
    ref_r = jnp.mean((coarse_r - tgt_r) ** 2) + jnp.mean((fine_r - tgt_r) ** 2)
    assert jnp.allclose(loss_r, ref_r, rtol=1e-5, atol=1e-6), (loss_r, ref_r)

    # 3) Multi-block / 2-split / clamped-grid accumulator path (forced tiles).
    sums = jax.block_until_ready(
        _sq_diff_sums((coarse, fine), tgt, max_tile_rows=128, force_splits=2))
    ref_sums = jnp.stack([jnp.sum((coarse - tgt) ** 2),
                          jnp.sum((fine - tgt) ** 2)])
    assert jnp.allclose(sums, ref_sums, rtol=1e-5, atol=1e-3), (sums, ref_sums)

    # 4) Tiny-input bypass path + coarse-only semantics.
    ks1, ks2 = jax.random.split(jax.random.PRNGKey(2), 2)
    shape_s = (2, 64, 3)
    coarse_s = jax.random.uniform(ks1, shape_s, dtype=jnp.float32)
    tgt_s = jax.random.uniform(ks2, shape_s, dtype=jnp.float32)
    loss_s = jax.block_until_ready(loss_fn({"coarse": {"rgb": coarse_s}}, tgt_s))
    ref_s = jnp.mean((coarse_s - tgt_s) ** 2)
    assert jnp.allclose(loss_s, ref_s, rtol=1e-5, atol=1e-6), (loss_s, ref_s)

    print("KERNEL_OK")
</pallas_src>

<mosaic_0001>
module attributes {stable_mosaic.version = 11 : i64} {
  func.func @kernel(%arg0: i32, %arg1: i32, %arg2: memref<384x128xf32, #tpu.memory_space<vmem>>, %arg3: memref<384x128xf32, #tpu.memory_space<vmem>>, %arg4: memref<384x128xf32, #tpu.memory_space<vmem>>, %arg5: memref<1x2x8x128xf32, #tpu.memory_space<vmem>>) attributes {dimension_semantics = [#tpu.dimension_semantics<parallel>, #tpu.dimension_semantics<arbitrary>], iteration_bounds = array<i64: 1, 1>, scalar_prefetch = 0 : i64, scratch_operands = 0 : i64, tpu.core_type = #tpu.core_type<tc>, window_params = [{transform_indices = @transform_0, window_bounds = array<i64: 384, 128>}, {transform_indices = @transform_1, window_bounds = array<i64: 384, 128>}, {transform_indices = @transform_2, window_bounds = array<i64: 384, 128>}, {transform_indices = @transform_3, window_bounds = array<i64: 1, 2, 8, 128>}]} {
    %c0_i32 = arith.constant 0 : i32
    %0 = arith.cmpi eq, %arg1, %c0_i32 : i32
    %1 = arith.extui %0 : i1 to i32
    %c0_i32_0 = arith.constant 0 : i32
    %2 = arith.cmpi ne, %1, %c0_i32_0 : i32
    scf.if %2 {
      %cst_22 = arith.constant 0.000000e+00 : f32
      %26 = vector.broadcast %cst_22 : f32 to vector<1x2x8x128xf32>
      %c0_23 = arith.constant 0 : index
      %c0_24 = arith.constant 0 : index
      %c0_25 = arith.constant 0 : index
      %c0_26 = arith.constant 0 : index
      %27 = vector.load %arg5[%c0_23, %c0_24, %c0_25, %c0_26] : memref<1x2x8x128xf32, #tpu.memory_space<vmem>>, vector<1x2x8x128xf32>
      tpu.vector_store %arg5[%c0_23, %c0_24, %c0_25, %c0_26], %26 {strides = array<i32>} : memref<1x2x8x128xf32, #tpu.memory_space<vmem>>, vector<1x2x8x128xf32>,
    } else {
    }
    %c0 = arith.constant 0 : index
    %c0_1 = arith.constant 0 : index
    %c0_2 = arith.constant 0 : index
    %c0_3 = arith.constant 0 : index
    %3 = vector.load %arg5[%c0, %c0_1, %c0_2, %c0_3] : memref<1x2x8x128xf32, #tpu.memory_space<vmem>>, vector<1x1x8x128xf32>
    %4 = vector.shape_cast %3 : vector<1x1x8x128xf32> to vector<8x128xf32>
    %c0_4 = arith.constant 0 : index
    %c1 = arith.constant 1 : index
    %c0_5 = arith.constant 0 : index
    %c0_6 = arith.constant 0 : index
    %5 = vector.load %arg5[%c0_4, %c1, %c0_5, %c0_6] : memref<1x2x8x128xf32, #tpu.memory_space<vmem>>, vector<1x1x8x128xf32>
    %6 = vector.shape_cast %5 : vector<1x1x8x128xf32> to vector<8x128xf32>
    %c0_7 = arith.constant 0 : index
    %c0_8 = arith.constant 0 : index
    %7 = vector.load %arg4[%c0_7, %c0_8] : memref<384x128xf32, #tpu.memory_space<vmem>>, vector<384x128xf32>
    %c0_9 = arith.constant 0 : index
    %c0_10 = arith.constant 0 : index
    %8 = vector.load %arg2[%c0_9, %c0_10] : memref<384x128xf32, #tpu.memory_space<vmem>>, vector<384x128xf32>
    %9 = arith.subf %8, %7 : vector<384x128xf32>
    %10 = arith.mulf %9, %9 : vector<384x128xf32>
    %11 = vector.shape_cast %10 : vector<384x128xf32> to vector<48x8x128xf32>
    %cst = arith.constant dense<0.000000e+00> : vector<8x128xf32>
    %12 = vector.multi_reduction <add>, %11, %cst [0] : vector<48x8x128xf32> to vector<8x128xf32>
    %13 = arith.addf %4, %12 : vector<8x128xf32>
    %c0_11 = arith.constant 0 : index
    %c0_12 = arith.constant 0 : index
    %14 = vector.load %arg3[%c0_11, %c0_12] : memref<384x128xf32, #tpu.memory_space<vmem>>, vector<384x128xf32>
    %15 = arith.subf %14, %7 : vector<384x128xf32>
    %16 = arith.mulf %15, %15 : vector<384x128xf32>
    %17 = vector.shape_cast %16 : vector<384x128xf32> to vector<48x8x128xf32>
    %cst_13 = arith.constant dense<0.000000e+00> : vector<8x128xf32>
    %18 = vector.multi_reduction <add>, %17, %cst_13 [0] : vector<48x8x128xf32> to vector<8x128xf32>
    %19 = arith.addf %6, %18 : vector<8x128xf32>
    %c0_14 = arith.constant 0 : index
    %c0_15 = arith.constant 0 : index
    %c0_16 = arith.constant 0 : index
    %c0_17 = arith.constant 0 : index
    %20 = vector.load %arg5[%c0_14, %c0_15, %c0_16, %c0_17] : memref<1x2x8x128xf32, #tpu.memory_space<vmem>>, vector<1x1x8x128xf32>
    %21 = vector.shape_cast %20 : vector<1x1x8x128xf32> to vector<8x128xf32>
    %22 = vector.shape_cast %13 : vector<8x128xf32> to vector<1x1x8x128xf32>
    tpu.vector_store %arg5[%c0_14, %c0_15, %c0_16, %c0_17], %22 {strides = array<i32>} : memref<1x2x8x128xf32, #tpu.memory_space<vmem>>, vector<1x1x8x128xf32>,
    %c0_18 = arith.constant 0 : index
    %c1_19 = arith.constant 1 : index
    %c0_20 = arith.constant 0 : index
    %c0_21 = arith.constant 0 : index
    %23 = vector.load %arg5[%c0_18, %c1_19, %c0_20, %c0_21] : memref<1x2x8x128xf32, #tpu.memory_space<vmem>>, vector<1x1x8x128xf32>
    %24 = vector.shape_cast %23 : vector<1x1x8x128xf32> to vector<8x128xf32>
    %25 = vector.shape_cast %19 : vector<8x128xf32> to vector<1x1x8x128xf32>
    tpu.vector_store %arg5[%c0_18, %c1_19, %c0_20, %c0_21], %25 {strides = array<i32>} : memref<1x2x8x128xf32, #tpu.memory_space<vmem>>, vector<1x1x8x128xf32>,
    return
  }
  func.func @transform_0(%arg0: i32, %arg1: i32) -> (i32, i32) {
    %c1_i32 = arith.constant 1 : i32
    %0 = arith.muli %arg0, %c1_i32 : i32
    %1 = arith.addi %0, %arg1 : i32
    %c0_i32 = arith.constant 0 : i32
    %c0_i32_0 = arith.constant 0 : i32
    return %1, %c0_i32 : i32, i32
  }
  func.func @transform_1(%arg0: i32, %arg1: i32) -> (i32, i32) {
    %c1_i32 = arith.constant 1 : i32
    %0 = arith.muli %arg0, %c1_i32 : i32
    %1 = arith.addi %0, %arg1 : i32
    %c0_i32 = arith.constant 0 : i32
    %c0_i32_0 = arith.constant 0 : i32
    return %1, %c0_i32 : i32, i32
  }
  func.func @transform_2(%arg0: i32, %arg1: i32) -> (i32, i32) {
    %c1_i32 = arith.constant 1 : i32
    %0 = arith.muli %arg0, %c1_i32 : i32
    %1 = arith.addi %0, %arg1 : i32
    %c0_i32 = arith.constant 0 : i32
    %c0_i32_0 = arith.constant 0 : i32
    return %1, %c0_i32 : i32, i32
  }
  func.func @transform_3(%arg0: i32, %arg1: i32) -> (i32, i32, i32, i32) {
    %c0_i32 = arith.constant 0 : i32
    %c0_i32_0 = arith.constant 0 : i32
    %c0_i32_1 = arith.constant 0 : i32
    %c0_i32_2 = arith.constant 0 : i32
    return %arg0, %c0_i32, %c0_i32_0, %c0_i32_1 : i32, i32, i32, i32
  }
}

</mosaic_0001>

<bundles_post_ra>
// kernel: mse_loss.1
= control target key start
LH: loop header
LB: loop body
LE: loop exit
PB: predicated region body
PF: predicated region fallthrough
CT: control target
= control target key end

     0   :  { %s1318_s2 = inlined_call_operand.vmem [shape: f32[384,128], index: 2, kind: input, shape index: {}]   ;;  %s1319_s0 = inlined_call_operand.vmem [shape: f32[384,128], index: 0, kind: input, shape index: {}]   ;;  %s1320_s1 = inlined_call_operand.vmem [shape: f32[384,128], index: 1, kind: input, shape index: {}]   ;;  %s1321_s3 = inlined_call_operand.vmem [shape: f32[1,2,8,128], index: 3, kind: output, shape index: {}]  }
   0x1   :  { %v571_v0 = vld [vmem:[%s1318_s2 + $0x108] sm:$0xff]  ;;  %v576_v1 = vld [vmem:[%s1318_s2 + $0x110] sm:$0xff]  ;;  %v581_v2 = vld [vmem:[%s1318_s2 + $0x118] sm:$0xff] }
   0x2   :  { %v586_v3 = vld [vmem:[%s1318_s2 + $0x120] sm:$0xff]  ;;  %v591_v4 = vld [vmem:[%s1318_s2 + $0x128] sm:$0xff]  ;;  %v596_v5 = vld [vmem:[%s1318_s2 + $0x130] sm:$0xff] }
   0x3   :  { %v601_v6 = vld [vmem:[%s1318_s2 + $0x138] sm:$0xff]  ;;  %v606_v7 = vld [vmem:[%s1318_s2 + $0x140] sm:$0xff]  ;;  %v611_v8 = vld [vmem:[%s1318_s2 + $0x148] sm:$0xff] }
   0x4   :  { %v616_v9 = vld [vmem:[%s1318_s2 + $0x150] sm:$0xff]  ;;  %v621_v10 = vld [vmem:[%s1318_s2 + $0x158] sm:$0xff]  ;;  %v626_v11 = vld [vmem:[%s1318_s2 + $0x160] sm:$0xff] }
   0x5   :  { %v631_v12 = vld [vmem:[%s1318_s2 + $0x168] sm:$0xff]  ;;  %v636_v13 = vld [vmem:[%s1318_s2 + $0x170] sm:$0xff]  ;;  %v641_v14 = vld [vmem:[%s1318_s2 + $0x178] sm:$0xff] }
   0x6   :  { %v170_v15 = vld [vmem:[%s1319_s0 + $0x108] sm:$0xff]  ;;  %v171_v16 = vld [vmem:[%s1319_s0 + $0x110] sm:$0xff]  ;;  %v172_v17 = vld [vmem:[%s1319_s0 + $0x118] sm:$0xff] }
   0x7   :  { %v655_v18 = vld [vmem:[%s1318_s2] sm:$0xff]  ;;  %v660_v19 = vld [vmem:[%s1318_s2 + $0x8] sm:$0xff]  ;;  %v175_v24 = vld [vmem:[%s1319_s0 + $0x130] sm:$0xff]  ;;  %v678_v25 = vsub.f32 %v170_v15, %v571_v0  ;;  %v681_v26 = vsub.f32 %v171_v16, %v576_v1  ;;  %v684_v27 = vsub.f32 %v172_v17, %v581_v2 }
   0x8   :  { %v137_v20 = vld [vmem:[%s1319_s0] sm:$0xff]  ;;  %v138_v21 = vld [vmem:[%s1319_s0 + $0x8] sm:$0xff]  ;;  %v176_v28 = vld [vmem:[%s1319_s0 + $0x138] sm:$0xff]  ;;  %v702_v33 = vsub.f32 %v175_v24, %v596_v5 }
   0x9   :  { %v173_v22 = vld [vmem:[%s1319_s0 + $0x120] sm:$0xff]  ;;  %v174_v23 = vld [vmem:[%s1319_s0 + $0x128] sm:$0xff]  ;;  %v179_v34 = vld [vmem:[%s1319_s0 + $0x150] sm:$0xff]  ;;  %v714_v37 = vsub.f32 %v176_v28, %v601_v6  ;;  %v185_v51 = vsub.f32 %v137_v20, %v655_v18  ;;  %v186_v52 = vsub.f32 %v138_v21, %v660_v19 }
   0xa   :  { %v177_v29 = vld [vmem:[%s1319_s0 + $0x140] sm:$0xff]  ;;  %v178_v30 = vld [vmem:[%s1319_s0 + $0x148] sm:$0xff]  ;;  %v696_v31 = vsub.f32 %v173_v22, %v586_v3  ;;  %v699_v32 = vsub.f32 %v174_v23, %v591_v4  ;;  %v180_v35 = vld [vmem:[%s1319_s0 + $0x158] sm:$0xff]  ;;  %v732_v43 = vsub.f32 %v179_v34, %v616_v9 }
   0xb   :  { %v181_v36 = vld [vmem:[%s1319_s0 + $0x160] sm:$0xff]  ;;  %v717_v38 = vsub.f32 %v177_v29, %v606_v7  ;;  %v720_v39 = vsub.f32 %v178_v30, %v611_v8  ;;  %v182_v40 = vld [vmem:[%s1319_s0 + $0x168] sm:$0xff]  ;;  %v183_v41 = vld [vmem:[%s1319_s0 + $0x170] sm:$0xff]  ;;  %v735_v44 = vsub.f32 %v180_v35, %v621_v10  ;;  %v233_v59 = vmul.f32 %v185_v51, %v185_v51 }
   0xc   :  { %v184_v42 = vld [vmem:[%s1319_s0 + $0x178] sm:$0xff]  ;;  %v738_v45 = vsub.f32 %v181_v36, %v626_v11  ;;  %v743_v46 = vld [vmem:[%s1318_s2 + $0x10] sm:$0xff]  ;;  %v749_v48 = vsub.f32 %v182_v40, %v631_v12  ;;  %v752_v49 = vsub.f32 %v183_v41, %v636_v13  ;;  %v771_v56 = vld [vmem:[%s1318_s2 + $0x20] sm:$0xff]  ;;  %v234_v60 = vmul.f32 %v186_v52, %v186_v52 }
   0xd   :  { %v139_v47 = vld [vmem:[%s1319_s0 + $0x10] sm:$0xff]  ;;  %v755_v50 = vsub.f32 %v184_v42, %v641_v14  ;;  %v762_v53 = vld [vmem:[%s1318_s2 + $0x18] sm:$0xff]  ;;  %v141_v57 = vld [vmem:[%s1319_s0 + $0x20] sm:$0xff] }
   0xe   :  { %1322 = vst [vmem:[#allocation2_spill] sm:$0xff] %v749_v48  ;;  %1323 = vst [vmem:[#allocation3_spill] sm:$0xff] %v752_v49  ;;  %v140_v54 = vld [vmem:[%s1319_s0 + $0x18] sm:$0xff]  ;;  %v187_v55 = vsub.f32 %v139_v47, %v743_v46  ;;  %v780_v61 = vld [vmem:[%s1318_s2 + $0x28] sm:$0xff]  ;;  %v189_v63 = vsub.f32 %v141_v57, %v771_v56  ;;  %v281_v22 = vadd.f32 %v234_v60, %v233_v59 }
   0xf   :  { %1324 = vst [vmem:[#allocation4_spill] sm:$0xff] %v755_v50  ;;  %v188_v58 = vsub.f32 %v140_v54, %v762_v53  ;;  %v142_v62 = vld [vmem:[%s1319_s0 + $0x28] sm:$0xff]  ;;  %v789_v16 = vld [vmem:[%s1318_s2 + $0x30] sm:$0xff]  ;;  %v798_v23 = vld [vmem:[%s1318_s2 + $0x38] sm:$0xff] }
  0x10   :  { %v235_v15 = vmul.f32 %v187_v55, %v187_v55  ;;  %v143_v17 = vld [vmem:[%s1319_s0 + $0x30] sm:$0xff]  ;;  %v190_v20 = vsub.f32 %v142_v62, %v780_v61  ;;  %v803_v24 = vld [vmem:[%s1318_s2 + $0x40] sm:$0xff]  ;;  %v144_v28 = vld [vmem:[%s1319_s0 + $0x38] sm:$0xff]  ;;  %v237_v36 = vmul.f32 %v189_v63, %v189_v63 }
  0x11   :  { %v236_v21 = vmul.f32 %v188_v58, %v188_v58  ;;  %v811_v29 = vld [vmem:[%s1318_s2 + $0x48] sm:$0xff]  ;;  %v145_v30 = vld [vmem:[%s1319_s0 + $0x40] sm:$0xff]  ;;  %v191_v35 = vsub.f32 %v143_v17, %v789_v16  ;;  %v192_v41 = vsub.f32 %v144_v28, %v798_v23  ;;  %v824_v51 = vld [vmem:[%s1318_s2 + $0x50] sm:$0xff] }
  0x12   :  { %v146_v34 = vld [vmem:[%s1319_s0 + $0x48] sm:$0xff]  ;;  %v282_v40 = vadd.f32 %v281_v22, %v235_v15  ;;  %v238_v42 = vmul.f32 %v190_v20, %v190_v20  ;;  %v829_v52 = vld [vmem:[%s1318_s2 + $0x58] sm:$0xff]  ;;  %v147_v54 = vld [vmem:[%s1319_s0 + $0x50] sm:$0xff]  ;;  %v193_v55 = vsub.f32 %v145_v30, %v803_v24 }
  0x13   :  { %v194_v57 = vsub.f32 %v146_v34, %v811_v29  ;;  %v148_v58 = vld [vmem:[%s1319_s0 + $0x58] sm:$0xff]  ;;  %v239_v59 = vmul.f32 %v191_v35, %v191_v35  ;;  %v362_v62 = vld [vmem:[%s1320_s1 + $0x108] sm:$0xff]  ;;  %v363_v63 = vld [vmem:[%s1320_s1 + $0x110] sm:$0xff]  ;;  %v195_v35 = vsub.f32 %v147_v54, %v824_v51 }
  0x14   :  { %v283_v47 = vadd.f32 %v282_v40, %v236_v21  ;;  %v364_v15 = vld [vmem:[%s1320_s1 + $0x118] sm:$0xff]  ;;  %v365_v17 = vld [vmem:[%s1320_s1 + $0x120] sm:$0xff]  ;;  %v366_v20 = vld [vmem:[%s1320_s1 + $0x128] sm:$0xff]  ;;  %v240_v21 = vmul.f32 %v192_v41, %v192_v41  ;;  %v241_v40 = vmul.f32 %v193_v55, %v193_v55  ;;  %v887_v49 = vsub.f32 %v363_v63, %v576_v1 }
  0x15   :  { %v367_v28 = vld [vmem:[%s1320_s1 + $0x130] sm:$0xff]  ;;  %v368_v30 = vld [vmem:[%s1320_s1 + $0x138] sm:$0xff]  ;;  %v369_v34 = vld [vmem:[%s1320_s1 + $0x140] sm:$0xff]  ;;  %v907_v1 = vsub.f32 %v366_v20, %v591_v4 }
  0x16   :  { %v284_v60 = vadd.f32 %v283_v47, %v237_v36  ;;  %v196_v36 = vsub.f32 %v148_v58, %v829_v52  ;;  %v242_v47 = vmul.f32 %v194_v57, %v194_v57  ;;  %v370_v41 = vld [vmem:[%s1320_s1 + $0x148] sm:$0xff]  ;;  %v373_v54 = vld [vmem:[%s1320_s1 + $0x160] sm:$0xff]  ;;  %v375_v57 = vld [vmem:[%s1320_s1 + $0x170] sm:$0xff]  ;;  %v884_v58 = vsub.f32 %v362_v62, %v571_v0  ;;  %1326 = vst [vmem:[#allocation6_spill] sm:$0xff] %v887_v49 }
  0x17   :  { %v374_v55 = vld [vmem:[%s1320_s1 + $0x168] sm:$0xff]  ;;  %v149_v48 = vld [vmem:[%s1319_s0 + $0x60] sm:$0xff]  ;;  %v376_v0 = vld [vmem:[%s1320_s1 + $0x178] sm:$0xff]  ;;  %v904_v62 = vsub.f32 %v365_v17, %v586_v3  ;;  %v913_v63 = vsub.f32 %v368_v30, %v601_v6  ;;  %v919_v49 = vsub.f32 %v370_v41, %v611_v8  ;;  %v936_v6 = vsub.f32 %v373_v54, %v626_v11 }
  0x18   :  { %v285_v22 = vadd.f32 %v284_v60, %v238_v42  ;;  %v371_v42 = vld [vmem:[%s1320_s1 + $0x150] sm:$0xff]  ;;  %v372_v60 = vld [vmem:[%s1320_s1 + $0x158] sm:$0xff]  ;;  %1325 = vst [vmem:[#allocation5_spill] sm:$0xff] %v884_v58  ;;  %v927_v3 = vld [vmem:[%s1318_s2 + $0x68] sm:$0xff]  ;;  %v942_v8 = vsub.f32 %v375_v57, %v636_v13  ;;  %v946_v20 = vsub.f32 %v376_v0, %v641_v14 }
  0x19   :  { %v922_v58 = vsub.f32 %v371_v42, %v616_v9  ;;  %v150_v4 = vld [vmem:[%s1319_s0 + $0x68] sm:$0xff]  ;;  %1329 = vst [vmem:[#allocation9_spill] sm:$0xff] %v936_v6  ;;  %v151_v11 = vld [vmem:[%s1319_s0 + $0x70] sm:$0xff]  ;;  %v152_v13 = vld [vmem:[%s1319_s0 + $0x78] sm:$0xff] }
  0x1a   :  { %v286_v50 = vadd.f32 %v285_v22, %v239_v59  ;;  %v890_v59 = vsub.f32 %v364_v15, %v581_v2  ;;  %v895_v22 = vld [vmem:[%s1318_s2 + $0x60] sm:$0xff]  ;;  %v910_v2 = vsub.f32 %v367_v28, %v596_v5  ;;  %v933_v5 = vsub.f32 %v372_v60, %v621_v10  ;;  %1331 = vst [vmem:[#allocation11_spill] sm:$0xff] %v942_v8  ;;  %v951_v10 = vld [vmem:[%s1318_s2 + $0x70] sm:$0xff]  ;;  %v330_v30 = vld [vmem:[%s1320_s1 + $0x8] sm:$0xff] }
  0x1b   :  { %v197_v9 = vsub.f32 %v149_v48, %v895_v22  ;;  %1332 = vst [vmem:[#allocation12_spill] sm:$0xff] %v946_v20  ;;  %v198_v14 = vsub.f32 %v150_v4, %v927_v3  ;;  %v244_v48 = vmul.f32 %v196_v36, %v196_v36  ;;  %v329_v28 = vld [vmem:[%s1320_s1] sm:$0xff]  ;;  %v331_v42 = vld [vmem:[%s1320_s1 + $0x10] sm:$0xff]  ;;  %v987_v60 = vld [vmem:[%s1318_s2 + $0x88] sm:$0xff] }
  0x1c   :  { %1327 = vst [vmem:[#allocation7_spill] sm:$0xff] %v890_v59  ;;  %v287_v15 = vadd.f32 %v286_v50, %v240_v21  ;;  %v916_v59 = vsub.f32 %v369_v34, %v606_v7  ;;  %1328 = vst [vmem:[#allocation8_spill] sm:$0xff] %v933_v5  ;;  %v939_v7 = vsub.f32 %v374_v55, %v631_v12  ;;  %v959_v12 = vld [vmem:[%s1318_s2 + $0x78] sm:$0xff]  ;;  %v975_v41 = vld [vmem:[%s1318_s2 + $0x80] sm:$0xff] }
  0x1d   :  { %v243_v50 = vmul.f32 %v195_v35, %v195_v35  ;;  %v199_v34 = vsub.f32 %v151_v11, %v951_v10  ;;  %v245_v35 = vmul.f32 %v197_v9, %v197_v9  ;;  %v153_v36 = vld [vmem:[%s1319_s0 + $0x80] sm:$0xff]  ;;  %v154_v54 = vld [vmem:[%s1319_s0 + $0x88] sm:$0xff]  ;;  %v246_v55 = vmul.f32 %v198_v14, %v198_v14  ;;  %v332_v4 = vld [vmem:[%s1320_s1 + $0x18] sm:$0xff] }
  0x1e   :  { %1330 = vst [vmem:[#allocation10_spill] sm:$0xff] %v939_v7  ;;  %v288_v17 = vadd.f32 %v287_v15, %v241_v40  ;;  %v377_v0 = vsub.f32 %v329_v28, %v655_v18  ;;  %v378_v15 = vsub.f32 %v330_v30, %v660_v19  ;;  %v1000_v9 = vld [vmem:[%s1318_s2 + $0x90] sm:$0xff]  ;;  %v379_v18 = vsub.f32 %v331_v42, %v743_v46  ;;  %v156_v28 = vld [vmem:[%s1319_s0 + $0x98] sm:$0xff]  ;;  %v157_v42 = vld [vmem:[%s1319_s0 + $0xa0] sm:$0xff] }
  0x1f   :  { %v247_v11 = vmul.f32 %v199_v34, %v199_v34  ;;  %v202_v19 = vsub.f32 %v154_v54, %v987_v60  ;;  %v380_v34 = vsub.f32 %v332_v4, %v762_v53  ;;  %v335_v4 = vld [vmem:[%s1320_s1 + $0x30] sm:$0xff] }
  0x20   :  { %v289_v21 = vadd.f32 %v288_v17, %v242_v47  ;;  %v200_v47 = vsub.f32 %v152_v13, %v959_v12  ;;  %v201_v17 = vsub.f32 %v153_v36, %v975_v41  ;;  %v425_v46 = vmul.f32 %v377_v0, %v377_v0  ;;  %v334_v36 = vld [vmem:[%s1320_s1 + $0x28] sm:$0xff] }
  0x22   :  { %v290_v40 = vadd.f32 %v289_v21, %v243_v50  ;;  %v155_v50 = vld [vmem:[%s1319_s0 + $0x90] sm:$0xff]  ;;  %v248_v14 = vmul.f32 %v200_v47, %v200_v47  ;;  %v1014_v21 = vld [vmem:[%s1318_s2 + $0x98] sm:$0xff]  ;;  %v1027_v47 = vld [vmem:[%s1318_s2 + $0xa0] sm:$0xff]  ;;  %v249_v54 = vmul.f32 %v201_v17, %v201_v17 }
  0x23   :  { %v204_v0 = vsub.f32 %v156_v28, %v1014_v21  ;;  %v158_v17 = vld [vmem:[%s1319_s0 + $0xa8] sm:$0xff]  ;;  %v336_v28 = vld [vmem:[%s1320_s1 + $0x38] sm:$0xff] }
  0x24   :  { %v291_v57 = vadd.f32 %v290_v40, %v244_v48  ;;  %v333_v48 = vld [vmem:[%s1320_s1 + $0x20] sm:$0xff]  ;;  %v203_v40 = vsub.f32 %v155_v50, %v1000_v9  ;;  %v1040_v50 = vld [vmem:[%s1318_s2 + $0xa8] sm:$0xff] }
  0x25   :  { %v381_v53 = vsub.f32 %v333_v48, %v771_v56  ;;  %v382_v56 = vsub.f32 %v334_v36, %v780_v61  ;;  %v383_v61 = vsub.f32 %v335_v4, %v789_v16  ;;  %v337_v36 = vld [vmem:[%s1320_s1 + $0x40] sm:$0xff]  ;;  %v384_v16 = vsub.f32 %v336_v28, %v798_v23 }
  0x26   :  { %v292_v13 = vadd.f32 %v291_v57, %v245_v35  ;;  %v426_v35 = vmul.f32 %v378_v15, %v378_v15  ;;  %v427_v57 = vmul.f32 %v379_v18, %v379_v18  ;;  %v250_v15 = vmul.f32 %v202_v19, %v202_v19 }
  0x27   :  { %v205_v19 = vsub.f32 %v157_v42, %v1027_v47  ;;  %v251_v48 = vmul.f32 %v203_v40, %v203_v40  ;;  %v252_v40 = vmul.f32 %v204_v0, %v204_v0  ;;  %v1066_v42 = vld [vmem:[%s1318_s2 + $0xb8] sm:$0xff]  ;;  %v385_v23 = vsub.f32 %v337_v36, %v803_v24 }
  0x28   :  { %v293_v30 = vadd.f32 %v292_v13, %v246_v55  ;;  %v428_v13 = vmul.f32 %v380_v34, %v380_v34  ;;  %v473_v18 = vadd.f32 %v426_v35, %v425_v46  ;;  %v429_v34 = vmul.f32 %v381_v53, %v381_v53 }
  0x29   :  { %v206_v35 = vsub.f32 %v158_v17, %v1040_v50  ;;  %v430_v53 = vmul.f32 %v382_v56, %v382_v56  ;;  %v253_v4 = vmul.f32 %v205_v19, %v205_v19  ;;  %v338_v17 = vld [vmem:[%s1320_s1 + $0x48] sm:$0xff]  ;;  %v431_v56 = vmul.f32 %v383_v61, %v383_v61 }
  0x2a   :  { %v294_v55 = vadd.f32 %v293_v30, %v247_v11  ;;  %v1053_v30 = vld [vmem:[%s1318_s2 + $0xb0] sm:$0xff]  ;;  %v474_v46 = vadd.f32 %v473_v18, %v427_v57  ;;  %v1079_v18 = vld [vmem:[%s1318_s2 + $0xc0] sm:$0xff]  ;;  %v386_v24 = vsub.f32 %v338_v17, %v811_v29  ;;  %v432_v61 = vmul.f32 %v384_v16, %v384_v16 }
  0x2b   :  { %v254_v28 = vmul.f32 %v206_v35, %v206_v35  ;;  %v433_v16 = vmul.f32 %v385_v23, %v385_v23 }
  0x2c   :  { %v295_v11 = vadd.f32 %v294_v55, %v248_v14  ;;  %v159_v14 = vld [vmem:[%s1319_s0 + $0xb0] sm:$0xff]  ;;  %v475_v57 = vadd.f32 %v474_v46, %v428_v13  ;;  %v1092_v46 = vld [vmem:[%s1318_s2 + $0xc8] sm:$0xff]  ;;  %v434_v23 = vmul.f32 %v386_v24, %v386_v24 }
  0x2d   :  { %v207_v0 = vsub.f32 %v159_v14, %v1053_v30  ;;  %v339_v14 = vld [vmem:[%s1320_s1 + $0x50] sm:$0xff] }
  0x2e   :  { %v296_v55 = vadd.f32 %v295_v11, %v249_v54  ;;  %v160_v54 = vld [vmem:[%s1319_s0 + $0xb8] sm:$0xff]  ;;  %v476_v13 = vadd.f32 %v475_v57, %v429_v34  ;;  %v1105_v57 = vld [vmem:[%s1318_s2 + $0xd0] sm:$0xff]  ;;  %v387_v29 = vsub.f32 %v339_v14, %v824_v51 }
  0x2f   :  { %v208_v19 = vsub.f32 %v160_v54, %v1066_v42  ;;  %v255_v36 = vmul.f32 %v207_v0, %v207_v0  ;;  %v340_v54 = vld [vmem:[%s1320_s1 + $0x58] sm:$0xff] }
  0x30   :  { %v297_v11 = vadd.f32 %v296_v55, %v250_v15  ;;  %v161_v15 = vld [vmem:[%s1319_s0 + $0xc0] sm:$0xff]  ;;  %v477_v34 = vadd.f32 %v476_v13, %v430_v53  ;;  %v1118_v13 = vld [vmem:[%s1318_s2 + $0xd8] sm:$0xff]  ;;  %v388_v51 = vsub.f32 %v340_v54, %v829_v52  ;;  %v435_v24 = vmul.f32 %v387_v29, %v387_v29 }
  0x31   :  { %v209_v35 = vsub.f32 %v161_v15, %v1079_v18  ;;  %v256_v17 = vmul.f32 %v208_v19, %v208_v19  ;;  %v341_v15 = vld [vmem:[%s1320_s1 + $0x60] sm:$0xff] }
  0x32   :  { %v298_v55 = vadd.f32 %v297_v11, %v251_v48  ;;  %v162_v48 = vld [vmem:[%s1319_s0 + $0xc8] sm:$0xff]  ;;  %v478_v53 = vadd.f32 %v477_v34, %v431_v56  ;;  %v1131_v34 = vld [vmem:[%s1318_s2 + $0xe0] sm:$0xff]  ;;  %v389_v52 = vsub.f32 %v341_v15, %v895_v22  ;;  %v436_v29 = vmul.f32 %v388_v51, %v388_v51 }
  0x33   :  { %v210_v0 = vsub.f32 %v162_v48, %v1092_v46  ;;  %v257_v14 = vmul.f32 %v209_v35, %v209_v35  ;;  %v342_v48 = vld [vmem:[%s1320_s1 + $0x68] sm:$0xff] }
  0x34   :  { %v299_v11 = vadd.f32 %v298_v55, %v252_v40  ;;  %v163_v40 = vld [vmem:[%s1319_s0 + $0xd0] sm:$0xff]  ;;  %v479_v56 = vadd.f32 %v478_v53, %v432_v61  ;;  %v1144_v53 = vld [vmem:[%s1318_s2 + $0xe8] sm:$0xff]  ;;  %v390_v22 = vsub.f32 %v342_v48, %v927_v3  ;;  %v437_v51 = vmul.f32 %v389_v52, %v389_v52 }
  0x35   :  { %v211_v19 = vsub.f32 %v163_v40, %v1105_v57  ;;  %v258_v54 = vmul.f32 %v210_v0, %v210_v0  ;;  %v343_v40 = vld [vmem:[%s1320_s1 + $0x70] sm:$0xff] }
  0x36   :  { %v300_v55 = vadd.f32 %v299_v11, %v253_v4  ;;  %v164_v4 = vld [vmem:[%s1319_s0 + $0xd8] sm:$0xff]  ;;  %v480_v61 = vadd.f32 %v479_v56, %v433_v16  ;;  %v1157_v56 = vld [vmem:[%s1318_s2 + $0xf0] sm:$0xff]  ;;  %v391_v3 = vsub.f32 %v343_v40, %v951_v10  ;;  %v438_v52 = vmul.f32 %v390_v22, %v390_v22 }
  0x37   :  { %v212_v35 = vsub.f32 %v164_v4, %v1118_v13  ;;  %v259_v15 = vmul.f32 %v211_v19, %v211_v19  ;;  %v344_v4 = vld [vmem:[%s1320_s1 + $0x78] sm:$0xff] }
  0x38   :  { %v301_v11 = vadd.f32 %v300_v55, %v254_v28  ;;  %v165_v28 = vld [vmem:[%s1319_s0 + $0xe0] sm:$0xff]  ;;  %v481_v16 = vadd.f32 %v480_v61, %v434_v23  ;;  %v1170_v61 = vld [vmem:[%s1318_s2 + $0xf8] sm:$0xff]  ;;  %v392_v10 = vsub.f32 %v344_v4, %v959_v12  ;;  %v439_v22 = vmul.f32 %v391_v3, %v391_v3 }
  0x39   :  { %v213_v0 = vsub.f32 %v165_v28, %v1131_v34  ;;  %v260_v48 = vmul.f32 %v212_v35, %v212_v35  ;;  %v345_v28 = vld [vmem:[%s1320_s1 + $0x80] sm:$0xff] }
  0x3a   :  { %v302_v55 = vadd.f32 %v301_v11, %v255_v36  ;;  %v166_v36 = vld [vmem:[%s1319_s0 + $0xe8] sm:$0xff]  ;;  %v482_v23 = vadd.f32 %v481_v16, %v435_v24  ;;  %v1183_v16 = vld [vmem:[%s1318_s2 + $0x100] sm:$0xff]  ;;  %v393_v12 = vsub.f32 %v345_v28, %v975_v41  ;;  %v440_v8 = vmul.f32 %v392_v10, %v392_v10  ;;  %v348_v41 = vld [vmem:[%s1320_s1 + $0x98] sm:$0xff] }
  0x3b   :  { %v214_v19 = vsub.f32 %v166_v36, %v1144_v53  ;;  %v261_v40 = vmul.f32 %v213_v0, %v213_v0  ;;  %v346_v36 = vld [vmem:[%s1320_s1 + $0x88] sm:$0xff] }
  0x3c   :  { %v303_v11 = vadd.f32 %v302_v55, %v256_v17  ;;  %v167_v17 = vld [vmem:[%s1319_s0 + $0xf0] sm:$0xff]  ;;  %v483_v24 = vadd.f32 %v482_v23, %v436_v29  ;;  %v394_v20 = vsub.f32 %v346_v36, %v987_v60  ;;  %v266_v36 = vmul.f32 %v678_v25, %v678_v25 }
  0x3d   :  { %v215_v35 = vsub.f32 %v167_v17, %v1157_v56  ;;  %v262_v4 = vmul.f32 %v214_v19, %v214_v19  ;;  %v347_v17 = vld [vmem:[%s1320_s1 + $0x90] sm:$0xff] }
  0x3e   :  { %v304_v55 = vadd.f32 %v303_v11, %v257_v14  ;;  %v168_v14 = vld [vmem:[%s1319_s0 + $0xf8] sm:$0xff]  ;;  %v484_v29 = vadd.f32 %v483_v24, %v437_v51  ;;  %v395_v3 = vsub.f32 %v347_v17, %v1000_v9  ;;  %v441_v51 = vmul.f32 %v393_v12, %v393_v12  ;;  %v350_v24 = vld [vmem:[%s1320_s1 + $0xa8] sm:$0xff] }
  0x3f   :  { %v216_v0 = vsub.f32 %v168_v14, %v1170_v61  ;;  %v263_v5 = vmul.f32 %v215_v35, %v215_v35  ;;  %v396_v14 = vsub.f32 %v348_v41, %v1014_v21 }
  0x40   :  { %v305_v11 = vadd.f32 %v304_v55, %v258_v54  ;;  %v169_v54 = vld [vmem:[%s1319_s0 + $0x100] sm:$0xff]  ;;  %v485_v7 = vadd.f32 %v484_v29, %v438_v52  ;;  %v268_v29 = vmul.f32 %v684_v27, %v684_v27 }
  0x41   :  { %v217_v6 = vsub.f32 %v169_v54, %v1183_v16  ;;  %v264_v28 = vmul.f32 %v216_v0, %v216_v0  ;;  %v351_v54 = vld [vmem:[%s1320_s1 + $0xb0] sm:$0xff] }
  0x42   :  { %v306_v55 = vadd.f32 %v305_v11, %v259_v15  ;;  %v486_v19 = vadd.f32 %v485_v7, %v439_v22  ;;  %v442_v11 = vmul.f32 %v394_v20, %v394_v20  ;;  %v399_v12 = vsub.f32 %v351_v54, %v1053_v30  ;;  %v354_v30 = vld [vmem:[%s1320_s1 + $0xc8] sm:$0xff] }
  0x43   :  { %v265_v52 = vmul.f32 %v217_v6, %v217_v6  ;;  %v444_v6 = vmul.f32 %v396_v14, %v396_v14 }
  0x44   :  { %v307_v23 = vadd.f32 %v306_v55, %v260_v48  ;;  %v349_v48 = vld [vmem:[%s1320_s1 + $0xa0] sm:$0xff]  ;;  %v487_v10 = vadd.f32 %v486_v19, %v440_v8  ;;  %v398_v8 = vsub.f32 %v350_v24, %v1040_v50  ;;  %v267_v55 = vmul.f32 %v681_v26, %v681_v26 }
  0x45   :  { %v397_v9 = vsub.f32 %v349_v48, %v1027_v47  ;;  %v353_v50 = vld [vmem:[%s1320_s1 + $0xc0] sm:$0xff]  ;;  %v447_v27 = vmul.f32 %v399_v12, %v399_v12 }
  0x46   :  { %v308_v15 = vadd.f32 %v307_v23, %v261_v40  ;;  %v443_v40 = vmul.f32 %v395_v3, %v395_v3  ;;  %v488_v7 = vadd.f32 %v487_v10, %v441_v51  ;;  %v446_v26 = vmul.f32 %v398_v8, %v398_v8 }
  0x47   :  { %v445_v25 = vmul.f32 %v397_v9, %v397_v9  ;;  %v269_v23 = vmul.f32 %v696_v31, %v696_v31  ;;  %v270_v51 = vmul.f32 %v699_v32, %v699_v32 }
  0x48   :  { %v309_v60 = vadd.f32 %v308_v15, %v262_v4  ;;  %v489_v20 = vadd.f32 %v488_v7, %v442_v11  ;;  %v401_v15 = vsub.f32 %v353_v50, %v1079_v18  ;;  %v356_v18 = vld [vmem:[%s1320_s1 + $0xd8] sm:$0xff] }
  0x4a   :  { %v310_v35 = vadd.f32 %v309_v60, %v263_v5  ;;  %v352_v5 = vld [vmem:[%s1320_s1 + $0xb8] sm:$0xff]  ;;  %v490_v22 = vadd.f32 %v489_v20, %v443_v40  ;;  %v271_v60 = vmul.f32 %v702_v33, %v702_v33  ;;  %v449_v32 = vmul.f32 %v401_v15, %v401_v15 }
  0x4b   :  { %v400_v4 = vsub.f32 %v352_v5, %v1066_v42  ;;  %v355_v42 = vld [vmem:[%s1320_s1 + $0xd0] sm:$0xff]  ;;  %v273_v40 = vmul.f32 %v717_v38, %v717_v38 }
  0x4c   :  { %v311_v21 = vadd.f32 %v310_v35, %v264_v28  ;;  %v491_v17 = vadd.f32 %v490_v22, %v444_v6  ;;  %v402_v28 = vsub.f32 %v354_v30, %v1092_v46  ;;  %v403_v11 = vsub.f32 %v355_v42, %v1105_v57  ;;  %v357_v46 = vld [vmem:[%s1320_s1 + $0xe0] sm:$0xff]  ;;  %v358_v57 = vld [vmem:[%s1320_s1 + $0xe8] sm:$0xff] }
  0x4d   :  { %v448_v31 = vmul.f32 %v400_v4, %v400_v4  ;;  %v404_v35 = vsub.f32 %v356_v18, %v1118_v13  ;;  %v359_v13 = vld [vmem:[%s1320_s1 + $0xf0] sm:$0xff]  ;;  %v406_v6 = vsub.f32 %v358_v57, %v1144_v53  ;;  %v361_v53 = vld [vmem:[%s1320_s1 + $0x100] sm:$0xff] }
  0x4e   :  { %v312_v47 = vadd.f32 %v311_v21, %v265_v52  ;;  %v492_v3 = vadd.f32 %v491_v17, %v445_v25  ;;  %v272_v52 = vmul.f32 %v714_v37, %v714_v37  ;;  %v450_v33 = vmul.f32 %v402_v28, %v402_v28  ;;  %v1337_v18 = vld [vmem:[#allocation6_spill] sm:$0xff] }
  0x4f   :  { %v451_v37 = vmul.f32 %v403_v11, %v403_v11  ;;  %v274_v21 = vmul.f32 %v720_v39, %v720_v39  ;;  %v452_v38 = vmul.f32 %v404_v35, %v404_v35  ;;  %v276_v25 = vmul.f32 %v735_v44, %v735_v44 }
  0x50   :  { %v313_v0 = vadd.f32 %v312_v47, %v266_v36  ;;  %v493_v48 = vadd.f32 %v492_v3, %v446_v26  ;;  %v405_v36 = vsub.f32 %v357_v46, %v1131_v34  ;;  %v360_v34 = vld [vmem:[%s1320_s1 + $0xf8] sm:$0xff]  ;;  %v407_v47 = vsub.f32 %v359_v13, %v1157_v56 }
  0x51   :  { %v409_v56 = vsub.f32 %v361_v53, %v1183_v16 }
  0x52   :  { %v314_v41 = vadd.f32 %v313_v0, %v267_v55  ;;  %v494_v10 = vadd.f32 %v493_v48, %v447_v27  ;;  %v275_v55 = vmul.f32 %v732_v43, %v732_v43  ;;  %v453_v39 = vmul.f32 %v405_v36, %v405_v36  ;;  %v1334_v27 = vld [vmem:[#allocation3_spill] sm:$0xff] }
  0x53   :  { %v454_v43 = vmul.f32 %v406_v6, %v406_v6  ;;  %v277_v0 = vmul.f32 %v738_v45, %v738_v45  ;;  %v455_v26 = vmul.f32 %v407_v47, %v407_v47  ;;  %v279_v3 = vmul.f32 %v1334_v27, %v1334_v27 }
  0x54   :  { %v315_v19 = vadd.f32 %v314_v41, %v268_v29  ;;  %v495_v9 = vadd.f32 %v494_v10, %v448_v31  ;;  %v408_v29 = vsub.f32 %v360_v34, %v1170_v61  ;;  %v1336_v31 = vld [vmem:[#allocation5_spill] sm:$0xff]  ;;  %v1338_v10 = vld [vmem:[#allocation7_spill] sm:$0xff] }
  0x55   :  { %v458_v16 = vmul.f32 %v1336_v31, %v1336_v31 }
  0x56   :  { %v316_v14 = vadd.f32 %v315_v19, %v269_v23  ;;  %v496_v54 = vadd.f32 %v495_v9, %v449_v32  ;;  %v1333_v23 = vld [vmem:[#allocation2_spill] sm:$0xff]  ;;  %v456_v41 = vmul.f32 %v408_v29, %v408_v29  ;;  %v1335_v19 = vld [vmem:[#allocation4_spill] sm:$0xff] }
  0x57   :  { %v278_v44 = vmul.f32 %v1333_v23, %v1333_v23  ;;  %v280_v45 = vmul.f32 %v1335_v19, %v1335_v19 }
  0x58   :  { %v317_v24 = vadd.f32 %v316_v14, %v270_v51  ;;  %v497_v20 = vadd.f32 %v496_v54, %v450_v33  ;;  %v457_v51 = vmul.f32 %v409_v56, %v409_v56  ;;  %v459_v14 = vmul.f32 %v1337_v18, %v1337_v18 }
  0x59   :  { %v462_v33 = vmul.f32 %v907_v1, %v907_v1  ;;  %v466_v1 = vmul.f32 %v919_v49, %v919_v49 }
  0x5a   :  { %v318_v7 = vadd.f32 %v317_v24, %v271_v60  ;;  %v498_v12 = vadd.f32 %v497_v20, %v451_v37  ;;  %v461_v24 = vmul.f32 %v904_v62, %v904_v62  ;;  %v465_v62 = vmul.f32 %v916_v59, %v916_v59 }
  0x5c   :  { %v319_v8 = vadd.f32 %v318_v7, %v272_v52  ;;  %v499_v50 = vadd.f32 %v498_v12, %v452_v38  ;;  %v460_v52 = vmul.f32 %v1338_v10, %v1338_v10  ;;  %v464_v7 = vmul.f32 %v913_v63, %v913_v63  ;;  %v1340_v38 = vld [vmem:[#allocation9_spill] sm:$0xff] }
  0x5d   :  { %v469_v63 = vmul.f32 %v1340_v38, %v1340_v38 }
  0x5e   :  { %v320_v5 = vadd.f32 %v319_v8, %v273_v40  ;;  %v500_v17 = vadd.f32 %v499_v50, %v453_v39  ;;  %v463_v40 = vmul.f32 %v910_v2, %v910_v2  ;;  %v1339_v8 = vld [vmem:[#allocation8_spill] sm:$0xff] }
  0x5f   :  { %v468_v2 = vmul.f32 %v1339_v8, %v1339_v8  ;;  %v1343_v39 = vld [vmem:[#allocation12_spill] sm:$0xff] }
  0x60   :  { %v321_v22 = vadd.f32 %v320_v5, %v274_v21  ;;  %v501_v15 = vadd.f32 %v500_v17, %v454_v43  ;;  %v467_v21 = vmul.f32 %v922_v58, %v922_v58  ;;  %v1342_v5 = vld [vmem:[#allocation11_spill] sm:$0xff]  ;;  %v472_v58 = vmul.f32 %v1343_v39, %v1343_v39 }
  0x61   :  { %v471_v49 = vmul.f32 %v1342_v5, %v1342_v5 }
  0x62   :  { %v322_v4 = vadd.f32 %v321_v22, %v275_v55  ;;  %v502_v42 = vadd.f32 %v501_v15, %v455_v26  ;;  %v1341_v55 = vld [vmem:[#allocation10_spill] sm:$0xff] }
  0x63   :  { %v470_v59 = vmul.f32 %v1341_v55, %v1341_v55 }
  0x64   :  { %v323_v30 = vadd.f32 %v322_v4, %v276_v25  ;;  %v503_v48 = vadd.f32 %v502_v42, %v456_v41 }
  0x66   :  { %v324_v61 = vadd.f32 %v323_v30, %v277_v0  ;;  %v504_v11 = vadd.f32 %v503_v48, %v457_v51 }
  0x68   :  { %v325_v28 = vadd.f32 %v324_v61, %v278_v44  ;;  %v505_v46 = vadd.f32 %v504_v11, %v458_v16 }
  0x6a   :  { %v326_v60 = vadd.f32 %v325_v28, %v279_v3  ;;  %v506_v35 = vadd.f32 %v505_v46, %v459_v14 }
  0x6c   :  { %v327_v32 = vadd.f32 %v326_v60, %v280_v45  ;;  %v507_v9 = vadd.f32 %v506_v35, %v460_v52 }
  0x6e   :  { %521 = vst [vmem:[%s1321_s3] sm:$0xff] %v327_v32  ;;  %v508_v57 = vadd.f32 %v507_v9, %v461_v24 }
  0x70   :  { %v509_v36 = vadd.f32 %v508_v57, %v462_v33 }
  0x72   :  { %v510_v37 = vadd.f32 %v509_v36, %v463_v40 }
  0x74   :  { %v511_v54 = vadd.f32 %v510_v37, %v464_v7 }
  0x76   :  { %v512_v13 = vadd.f32 %v511_v54, %v465_v62 }
  0x78   :  { %v513_v6 = vadd.f32 %v512_v13, %v466_v1 }
  0x7a   :  { %v514_v20 = vadd.f32 %v513_v6, %v467_v21 }
  0x7c   :  { %v515_v34 = vadd.f32 %v514_v20, %v468_v2 }
  0x7e   :  { %v516_v47 = vadd.f32 %v515_v34, %v469_v63 }
  0x80   :  { %v517_v12 = vadd.f32 %v516_v47, %v470_v59 }
  0x82   :  { %v518_v25 = vadd.f32 %v517_v12, %v471_v49 }
  0x84   :  { %v519_v53 = vadd.f32 %v518_v25, %v472_v58 }
  0x86   :  { %546 = vst [vmem:[%s1321_s3 + $0x8] sm:$0xff] %v519_v53 }

</bundles_post_ra>
